<compile_context>
chip_gen: v7x
topology: tpu7x:2x2x1
jax: 0.10.0
libtpu: 0.0.40
codegen_flags: <defaults>
</compile_context>

<pallas_src>
import math

import jax
import jax.numpy as jnp
from jax.experimental import pallas as pl
from jax.experimental.pallas import tpu as pltpu

# ---------------------------------------------------------------------------
# Configuration (mirrors BaseBackbone's abstract properties)
# ---------------------------------------------------------------------------
NOISE_LEVEL_EMB_DIM = 128                               # noise_level_emb_dim
NOISE_LEVEL_DIM = max(NOISE_LEVEL_EMB_DIM // 4, 32)     # noise_level_dim = 32
EXTERNAL_COND_DIM = 4                                   # e.g. action dim
EXTERNAL_COND_EMB_DIM = NOISE_LEVEL_EMB_DIM             # combined by addition

PACK_W = 8                 # packed per-row input: [noise, mask, cond(4), 0, 0]
TILE_N_MAX = 4096          # rows per grid step
MEGACORE_SPLIT_N = 2048    # above this N, force >= 2 grid steps (v7x 2 TCs)
VMEM_LIMIT_BYTES = 32 * 1024 * 1024


def _cdiv(a, b):
    return (a + b - 1) // b


def _round_up(x, m):
    return _cdiv(x, m) * m


# ---------------------------------------------------------------------------
# Pallas kernel: sinusoidal embed -> MLP(SiLU) -> + masked cond embedding
# ---------------------------------------------------------------------------
def _backbone_embed_kernel(
    freqs_ref,   # [1, half]               f32  (pinned)
    pk_ref,      # [TILE_N, PACK_W]        f32  (noise | mask | cond | pad)
    w1_ref,      # [NOISE_LEVEL_DIM, EMB]  f32  (pinned)
    b1_ref,      # [1, EMB]                f32  (pinned)
    w2_ref,      # [EMB, EMB]              f32  (pinned)
    b2_ref,      # [1, EMB]                f32  (pinned; cond bias folded in)
    wcp_ref,     # [PACK_W, EMB]           f32  (pinned; rows 2:6 = wc, else 0)
    out_ref,     # [TILE_N, EMB]           f32
):
    half = NOISE_LEVEL_DIM // 2
    pk = pk_ref[...]                                     # [TN, PACK_W]
    t = pk[:, 0:1]                                       # noise levels
    mask = pk[:, 1:2]                                    # 1=keep cond, 0=drop

    arg = t * freqs_ref[...]                             # [TN, half]

    # SinusoidalPosEmb followed by the first Linear, without the lane concat:
    # cat([sin, cos], -1) @ W1  ==  sin(arg) @ W1[:half] + cos(arg) @ W1[half:]
    # (exact split kept; sin/cos phase-fusion skipped for bit-parity).
    h = jnp.dot(jnp.sin(arg), w1_ref[:half, :],
                preferred_element_type=jnp.float32)
    h = h + jnp.dot(jnp.cos(arg), w1_ref[half:, :],
                    preferred_element_type=jnp.float32)
    h = h + b1_ref[...]
    h = h * (1.0 / (1.0 + jnp.exp(-h)))                  # SiLU (EUP exp)

    acc = jnp.dot(h, w2_ref[...], preferred_element_type=jnp.float32)
    acc = acc + b2_ref[...]                              # b2 + bc (pre-folded)

    # External-cond embedding as one K=8 MXU matmul. The dropout mask is
    # folded into the LHS; noise/mask/pad columns hit zero rows of wcp so they
    # contribute nothing — no unaligned lane slicing needed.
    acc = acc + jnp.dot(pk * mask, wcp_ref[...],
                        preferred_element_type=jnp.float32)

    out_ref[...] = acc                                   # single f32 writeback


def backbone_embed(noise_levels, external_cond, external_cond_mask, params):
    """noise_levels: [B,T] f32; external_cond: [B,T,Dc] f32;
    external_cond_mask: [B,T] f32 (1=keep, 0=drop). Returns [B,T,EMB] f32."""
    B, T = noise_levels.shape
    N = B * T
    w1, b1, w2, b2, wc, bc = params
    b2_eff = b2 + bc  # cond bias always applied (zero-the-cond-input semantics)

    # Pack the three narrow per-row inputs into a single [N, 8] stream.
    noise_flat = noise_levels.reshape(N, 1).astype(jnp.float32)
    mask_flat = external_cond_mask.reshape(N, 1).astype(jnp.float32)
    cond_flat = external_cond.reshape(N, EXTERNAL_COND_DIM).astype(jnp.float32)
    pad_cols = PACK_W - 2 - EXTERNAL_COND_DIM
    packed = jnp.concatenate(
        [noise_flat, mask_flat, cond_flat,
         jnp.zeros((N, pad_cols), jnp.float32)], axis=-1)

    # Cond weight placed in the rows matching the packed cond columns.
    wc_pad = jnp.zeros((PACK_W, EXTERNAL_COND_EMB_DIM), jnp.float32)
    wc_pad = wc_pad.at[2:2 + EXTERNAL_COND_DIM].set(wc)

    # Hoisted frequency table for SinusoidalPosEmb(dim=NOISE_LEVEL_DIM).
    half = NOISE_LEVEL_DIM // 2
    freqs = jnp.exp(
        -(math.log(10000.0) / (half - 1))
        * jnp.arange(half, dtype=jnp.float32)
    ).reshape(1, half)

    # Tile selection: minimal padding (at most 7 junk rows per tile), and a
    # >=2-step grid when there is enough work to shard across v7x's two TCs.
    num_tiles = _cdiv(N, TILE_N_MAX)
    if num_tiles == 1 and N >= MEGACORE_SPLIT_N:
        num_tiles = 2
    tile_n = _round_up(_cdiv(N, num_tiles), 8)
    n_pad = num_tiles * tile_n
    if n_pad != N:
        packed = jnp.pad(packed, ((0, n_pad - N), (0, 0)))

    def const_spec(shape):
        return pl.BlockSpec(shape, lambda i: (0, 0))   # pinned across steps

    out = pl.pallas_call(
        _backbone_embed_kernel,
        out_shape=jax.ShapeDtypeStruct((n_pad, NOISE_LEVEL_EMB_DIM),
                                       jnp.float32),
        grid=(num_tiles,),
        in_specs=[
            const_spec((1, half)),                                   # freqs
            pl.BlockSpec((tile_n, PACK_W), lambda i: (i, 0)),        # packed
            const_spec((NOISE_LEVEL_DIM, NOISE_LEVEL_EMB_DIM)),      # w1
            const_spec((1, NOISE_LEVEL_EMB_DIM)),                    # b1
            const_spec((NOISE_LEVEL_EMB_DIM, NOISE_LEVEL_EMB_DIM)),  # w2
            const_spec((1, NOISE_LEVEL_EMB_DIM)),                    # b2+bc
            const_spec((PACK_W, EXTERNAL_COND_EMB_DIM)),             # wc_pad
        ],
        out_specs=pl.BlockSpec((tile_n, NOISE_LEVEL_EMB_DIM),
                               lambda i: (i, 0)),
        compiler_params=pltpu.CompilerParams(
            dimension_semantics=("parallel",),      # megacore shard on v7x
            vmem_limit_bytes=VMEM_LIMIT_BYTES,      # > v5e's 16 MiB default
        ),
    )(freqs, packed, w1, b1, w2, b2_eff, wc_pad)

    if n_pad != N:
        out = out[:N]
    return out.reshape(B, T, NOISE_LEVEL_EMB_DIM)


# ---------------------------------------------------------------------------
# Deterministic parameter init (shapes from BaseBackbone.__init__ submodules)
# ---------------------------------------------------------------------------
def init_params(key):
    k1, k2, k3 = jax.random.split(key, 3)
    scale1 = 1.0 / math.sqrt(NOISE_LEVEL_DIM)
    scale2 = 1.0 / math.sqrt(NOISE_LEVEL_EMB_DIM)
    scalec = 1.0 / math.sqrt(EXTERNAL_COND_DIM)
    w1 = jax.random.normal(k1, (NOISE_LEVEL_DIM, NOISE_LEVEL_EMB_DIM),
                           jnp.float32) * scale1
    b1 = jnp.zeros((1, NOISE_LEVEL_EMB_DIM), jnp.float32)
    w2 = jax.random.normal(k2, (NOISE_LEVEL_EMB_DIM, NOISE_LEVEL_EMB_DIM),
                           jnp.float32) * scale2
    b2 = jnp.zeros((1, NOISE_LEVEL_EMB_DIM), jnp.float32)
    wc = jax.random.normal(k3, (EXTERNAL_COND_DIM, EXTERNAL_COND_EMB_DIM),
                           jnp.float32) * scalec
    bc = jnp.zeros((1, EXTERNAL_COND_EMB_DIM), jnp.float32)
    return (w1, b1, w2, b2, wc, bc)


# ---------------------------------------------------------------------------
# Pure-JAX reference (PyTorch semantics) for a quick sanity check
# ---------------------------------------------------------------------------
def reference(noise_levels, external_cond, external_cond_mask, params):
    w1, b1, w2, b2, wc, bc = params
    B, T = noise_levels.shape
    t = noise_levels.reshape(-1, 1).astype(jnp.float32)
    half = NOISE_LEVEL_DIM // 2
    freqs = jnp.exp(-(math.log(10000.0) / (half - 1))
                    * jnp.arange(half, dtype=jnp.float32))
    arg = t * freqs[None, :]
    sin_emb = jnp.concatenate([jnp.sin(arg), jnp.cos(arg)], axis=-1)
    h = sin_emb @ w1 + b1
    h = h * jax.nn.sigmoid(h)
    noise_emb = h @ w2 + b2
    c = (external_cond.reshape(-1, EXTERNAL_COND_DIM)
         * external_cond_mask.reshape(-1, 1))
    cond_emb = c @ wc + bc
    return (noise_emb + cond_emb).reshape(B, T, NOISE_LEVEL_EMB_DIM)


if __name__ == "__main__":
    key = jax.random.PRNGKey(0)
    kp, kn, kc, km = jax.random.split(key, 4)
    params = init_params(kp)

    def run_case(B, T, kn, kc, km):
        noise_levels = jax.random.uniform(kn, (B, T), jnp.float32) * 1000.0
        external_cond = jax.random.normal(kc, (B, T, EXTERNAL_COND_DIM),
                                          jnp.float32)
        external_cond_mask = (jax.random.uniform(km, (B, T)) > 0.2).astype(
            jnp.float32)
        out = backbone_embed(noise_levels, external_cond, external_cond_mask,
                             params)
        out = jax.block_until_ready(out)
        ref = reference(noise_levels, external_cond, external_cond_mask,
                        params)
        assert out.shape == (B, T, NOISE_LEVEL_EMB_DIM)
        assert jnp.allclose(out, ref, atol=1e-4, rtol=1e-4), (
            f"mismatch vs reference at B={B}, T={T}")

    # Exact-tile case and a ragged case (exercises the tail-padding path).
    run_case(2, 8, kn, kc, km)
    run_case(3, 7, km, kn, kc)

    print("KERNEL_OK")
</pallas_src>

<mosaic_0001>
module attributes {stable_mosaic.version = 11 : i64} {
  func.func @_backbone_embed_kernel(%arg0: i32, %arg1: memref<1x16xf32, #tpu.memory_space<vmem>>, %arg2: memref<16x8xf32, #tpu.memory_space<vmem>>, %arg3: memref<32x128xf32, #tpu.memory_space<vmem>>, %arg4: memref<1x128xf32, #tpu.memory_space<vmem>>, %arg5: memref<128x128xf32, #tpu.memory_space<vmem>>, %arg6: memref<1x128xf32, #tpu.memory_space<vmem>>, %arg7: memref<8x128xf32, #tpu.memory_space<vmem>>, %arg8: memref<16x128xf32, #tpu.memory_space<vmem>>) attributes {dimension_semantics = [#tpu.dimension_semantics<parallel>], iteration_bounds = array<i64: 1>, scalar_prefetch = 0 : i64, scratch_operands = 0 : i64, tpu.core_type = #tpu.core_type<tc>, window_params = [{pipeline_mode = #tpu.pipeline_mode<synchronous>, transform_indices = @transform_0, window_bounds = array<i64: 1, 16>}, {transform_indices = @transform_1, window_bounds = array<i64: 16, 8>}, {pipeline_mode = #tpu.pipeline_mode<synchronous>, transform_indices = @transform_2, window_bounds = array<i64: 32, 128>}, {pipeline_mode = #tpu.pipeline_mode<synchronous>, transform_indices = @transform_3, window_bounds = array<i64: 1, 128>}, {pipeline_mode = #tpu.pipeline_mode<synchronous>, transform_indices = @transform_4, window_bounds = array<i64: 128, 128>}, {pipeline_mode = #tpu.pipeline_mode<synchronous>, transform_indices = @transform_5, window_bounds = array<i64: 1, 128>}, {pipeline_mode = #tpu.pipeline_mode<synchronous>, transform_indices = @transform_6, window_bounds = array<i64: 8, 128>}, {transform_indices = @transform_7, window_bounds = array<i64: 16, 128>}]} {
    %c0 = arith.constant 0 : index
    %c0_0 = arith.constant 0 : index
    %0 = vector.load %arg2[%c0, %c0_0] : memref<16x8xf32, #tpu.memory_space<vmem>>, vector<16x8xf32>
    %1 = vector.extract_strided_slice %0 {offsets = [0, 0], sizes = [16, 1], strides = [1, 1]} : vector<16x8xf32> to vector<16x1xf32>
    %2 = vector.extract_strided_slice %0 {offsets = [0, 1], sizes = [16, 1], strides = [1, 1]} : vector<16x8xf32> to vector<16x1xf32>
    %c0_1 = arith.constant 0 : index
    %c0_2 = arith.constant 0 : index
    %3 = vector.load %arg1[%c0_1, %c0_2] : memref<1x16xf32, #tpu.memory_space<vmem>>, vector<1x16xf32>
    %4 = vector.broadcast %1 : vector<16x1xf32> to vector<16x16xf32>
    %5 = vector.broadcast %3 : vector<1x16xf32> to vector<16x16xf32>
    %6 = arith.mulf %4, %5 : vector<16x16xf32>
    %7 = math.sin %6 : vector<16x16xf32>
    %c0_3 = arith.constant 0 : index
    %c0_4 = arith.constant 0 : index
    %8 = vector.load %arg3[%c0_3, %c0_4] : memref<32x128xf32, #tpu.memory_space<vmem>>, vector<16x128xf32>
    %cst = arith.constant dense<0.000000e+00> : vector<16x128xf32>
    %9 = tpu.matmul %7, %8, %cst {dimension_numbers = #tpu.dot_dimension_numbers<[1], [0], [0], [1], [0, 0, 1, 1], [], []>} : vector<16x16xf32>, vector<16x128xf32>, vector<16x128xf32> -> vector<16x128xf32>
    %10 = math.cos %6 : vector<16x16xf32>
    %c16 = arith.constant 16 : index
    %c0_5 = arith.constant 0 : index
    %11 = vector.load %arg3[%c16, %c0_5] : memref<32x128xf32, #tpu.memory_space<vmem>>, vector<16x128xf32>
    %cst_6 = arith.constant dense<0.000000e+00> : vector<16x128xf32>
    %12 = tpu.matmul %10, %11, %cst_6 {dimension_numbers = #tpu.dot_dimension_numbers<[1], [0], [0], [1], [0, 0, 1, 1], [], []>} : vector<16x16xf32>, vector<16x128xf32>, vector<16x128xf32> -> vector<16x128xf32>
    %13 = arith.addf %9, %12 : vector<16x128xf32>
    %c0_7 = arith.constant 0 : index
    %c0_8 = arith.constant 0 : index
    %14 = vector.load %arg4[%c0_7, %c0_8] : memref<1x128xf32, #tpu.memory_space<vmem>>, vector<1x128xf32>
    %15 = vector.broadcast %14 : vector<1x128xf32> to vector<16x128xf32>
    %16 = arith.addf %13, %15 : vector<16x128xf32>
    %cst_9 = arith.constant 0.000000e+00 : f32
    %17 = vector.broadcast %cst_9 : f32 to vector<16x128xf32>
    %18 = arith.subf %17, %16 : vector<16x128xf32>
    %19 = math.exp %18 : vector<16x128xf32>
    %cst_10 = arith.constant 1.000000e+00 : f32
    %20 = vector.broadcast %cst_10 : f32 to vector<16x128xf32>
    %21 = arith.addf %20, %19 : vector<16x128xf32>
    %cst_11 = arith.constant 1.000000e+00 : f32
    %22 = vector.broadcast %cst_11 : f32 to vector<16x128xf32>
    %23 = arith.divf %22, %21 : vector<16x128xf32>
    %24 = arith.mulf %16, %23 : vector<16x128xf32>
    %c0_12 = arith.constant 0 : index
    %c0_13 = arith.constant 0 : index
    %25 = vector.load %arg5[%c0_12, %c0_13] : memref<128x128xf32, #tpu.memory_space<vmem>>, vector<128x128xf32>
    %cst_14 = arith.constant dense<0.000000e+00> : vector<16x128xf32>
    %26 = tpu.matmul %24, %25, %cst_14 {dimension_numbers = #tpu.dot_dimension_numbers<[1], [0], [0], [1], [0, 0, 1, 1], [], []>} : vector<16x128xf32>, vector<128x128xf32>, vector<16x128xf32> -> vector<16x128xf32>
    %c0_15 = arith.constant 0 : index
    %c0_16 = arith.constant 0 : index
    %27 = vector.load %arg6[%c0_15, %c0_16] : memref<1x128xf32, #tpu.memory_space<vmem>>, vector<1x128xf32>
    %28 = vector.broadcast %27 : vector<1x128xf32> to vector<16x128xf32>
    %29 = arith.addf %26, %28 : vector<16x128xf32>
    %30 = vector.broadcast %2 : vector<16x1xf32> to vector<16x8xf32>
    %31 = arith.mulf %0, %30 : vector<16x8xf32>
    %c0_17 = arith.constant 0 : index
    %c0_18 = arith.constant 0 : index
    %32 = vector.load %arg7[%c0_17, %c0_18] : memref<8x128xf32, #tpu.memory_space<vmem>>, vector<8x128xf32>
    %cst_19 = arith.constant dense<0.000000e+00> : vector<16x128xf32>
    %33 = tpu.matmul %31, %32, %cst_19 {dimension_numbers = #tpu.dot_dimension_numbers<[1], [0], [0], [1], [0, 0, 1, 1], [], []>} : vector<16x8xf32>, vector<8x128xf32>, vector<16x128xf32> -> vector<16x128xf32>
    %34 = arith.addf %29, %33 : vector<16x128xf32>
    %c0_20 = arith.constant 0 : index
    %c0_21 = arith.constant 0 : index
    %35 = vector.load %arg8[%c0_20, %c0_21] : memref<16x128xf32, #tpu.memory_space<vmem>>, vector<16x128xf32>
    tpu.vector_store %arg8[%c0_20, %c0_21], %34 {strides = array<i32>} : memref<16x128xf32, #tpu.memory_space<vmem>>, vector<16x128xf32>,
    return
  }
  func.func @transform_0(%arg0: i32) -> (i32, i32) {
    %c0_i32 = arith.constant 0 : i32
    %c0_i32_0 = arith.constant 0 : i32
    %c0_i32_1 = arith.constant 0 : i32
    return %c0_i32, %c0_i32_0 : i32, i32
  }
  func.func @transform_1(%arg0: i32) -> (i32, i32) {
    %c0_i32 = arith.constant 0 : i32
    %c0_i32_0 = arith.constant 0 : i32
    return %arg0, %c0_i32 : i32, i32
  }
  func.func @transform_2(%arg0: i32) -> (i32, i32) {
    %c0_i32 = arith.constant 0 : i32
    %c0_i32_0 = arith.constant 0 : i32
    %c0_i32_1 = arith.constant 0 : i32
    return %c0_i32, %c0_i32_0 : i32, i32
  }
  func.func @transform_3(%arg0: i32) -> (i32, i32) {
    %c0_i32 = arith.constant 0 : i32
    %c0_i32_0 = arith.constant 0 : i32
    %c0_i32_1 = arith.constant 0 : i32
    return %c0_i32, %c0_i32_0 : i32, i32
  }
  func.func @transform_4(%arg0: i32) -> (i32, i32) {
    %c0_i32 = arith.constant 0 : i32
    %c0_i32_0 = arith.constant 0 : i32
    %c0_i32_1 = arith.constant 0 : i32
    return %c0_i32, %c0_i32_0 : i32, i32
  }
  func.func @transform_5(%arg0: i32) -> (i32, i32) {
    %c0_i32 = arith.constant 0 : i32
    %c0_i32_0 = arith.constant 0 : i32
    %c0_i32_1 = arith.constant 0 : i32
    return %c0_i32, %c0_i32_0 : i32, i32
  }
  func.func @transform_6(%arg0: i32) -> (i32, i32) {
    %c0_i32 = arith.constant 0 : i32
    %c0_i32_0 = arith.constant 0 : i32
    %c0_i32_1 = arith.constant 0 : i32
    return %c0_i32, %c0_i32_0 : i32, i32
  }
  func.func @transform_7(%arg0: i32) -> (i32, i32) {
    %c0_i32 = arith.constant 0 : i32
    %c0_i32_0 = arith.constant 0 : i32
    return %arg0, %c0_i32 : i32, i32
  }
}

</mosaic_0001>

<bundles_post_ra>
// kernel: tpu_custom_call.1
= control target key start
LH: loop header
LB: loop body
LE: loop exit
PB: predicated region body
PF: predicated region fallthrough
CT: control target
= control target key end

     0   :  { %12 = vsyncpa [#allocation3], 0  ;;  %s1399_s0 = inlined_call_operand.vmem [shape: f32[1,16], index: 0, kind: input, shape index: {}]   ;;  %s1400_s1 = inlined_call_operand.vmem [shape: f32[16,8], index: 1, kind: input, shape index: {}]   ;;  %s1401_s2 = inlined_call_operand.hbm [shape: f32[32,128], index: 2, kind: input, shape index: {}]   ;;  %s1402_s3 = inlined_call_operand.vmem [shape: f32[1,128], index: 3, kind: input, shape index: {}]   ;;  %s1403_s4 = inlined_call_operand.hbm [shape: f32[128,128], index: 4, kind: input, shape index: {}]   ;;  %s1404_s5 = inlined_call_operand.vmem [shape: f32[1,128], index: 5, kind: input, shape index: {}]   ;;  %s1405_s6 = inlined_call_operand.vmem [shape: f32[8,128], index: 6, kind: input, shape index: {}]   ;;  %s1406_s7 = inlined_call_operand.hbm [shape: f32[16,128], index: 7, kind: output, shape index: {}]  }
   0x1   :  { %13 = vsyncpa [#allocation6], 0 }
   0x2   :  { %14 = vsyncpa [#allocation4], 0  ;;  %s1159_s24 = smov [#allocation2]   ;;  %s1087_s28 = scalar_lea.hbm %s1401_s2, 512 }
   0x3   :  { %s24_s25 = sshll.u32 %s1159_s24, 4  ;;  %p1088_p0 = scmp.ne.s32.totalorder %s1401_s2, %s1087_s28  ;;  %s25_s25 = int_to_ptr.vmem [resolvable:$true] %s24_s25 }
   0x4   :  { %p1091_p1 = scmp.lt.u32.totalorder %s1087_s28, %s1401_s2 }
   0x6   :  { %p1093_p2 = pnand %p1091_p1, %p1088_p0 }
   0x8   :  { %1096 = shalt.err (!%p1093_p2)
}
   0x9   :  { %s1097_s10 = scalar_lea.vmem %s25_s25, 512  ;;  %p1102_p4 = scmp.lt.s32.totalorder %s25_s25, %s25_s25 }
   0xa   :  { %p1098_p3 = scmp.ne.s32.totalorder %s25_s25, %s1097_s10  ;;  %p1103_p5 = scmp.lt.s32.totalorder %s1097_s10, %s1097_s10 }
   0xc   :  { %p1104_p6 = por %p1103_p5, %p1102_p4 }
   0xe   :  { %p1105_p7 = pnand %p1104_p6, %p1098_p3 }
  0x10   :  { %1108 = shalt.err (!%p1105_p7)
}
  0x11   :  { %s1160_s11 = smov 128   ;;  %s1161_s12 = smov 8  }
  0x12   :  { %30 = dma.hbm_to_vmem [thread:$0]  %s1401_s2, 512, %s25_s25, [#allocation3], %s1160_s11, %s1160_s11, %s1161_s12  }
  0x13   :  { %s1162_s15 = smov [#allocation5]   ;;  %s1109_s19 = scalar_lea.hbm %s1403_s4, 2048 }
  0x14   :  { %s38_s16 = sshll.u32 %s1162_s15, 4  ;;  %p1110_p8 = scmp.ne.s32.totalorder %s1403_s4, %s1109_s19  ;;  %s39_s16 = int_to_ptr.vmem [resolvable:$true] %s38_s16 }
  0x15   :  { %p1113_p9 = scmp.lt.u32.totalorder %s1109_s19, %s1403_s4 }
  0x17   :  { %p1115_p10 = pnand %p1113_p9, %p1110_p8 }
  0x19   :  { %1118 = shalt.err (!%p1115_p10)
}
  0x1a   :  { %s1119_s24 = scalar_lea.vmem %s39_s16, 2048  ;;  %p1124_p12 = scmp.lt.s32.totalorder %s39_s16, %s39_s16 }
  0x1b   :  { %p1120_p11 = scmp.ne.s32.totalorder %s39_s16, %s1119_s24  ;;  %p1125_p13 = scmp.lt.s32.totalorder %s1119_s24, %s1119_s24 }
  0x1d   :  { %p1126_p0 = por %p1125_p13, %p1124_p12 }
  0x1f   :  { %p1127_p1 = pnand %p1126_p0, %p1120_p11 }
  0x21   :  { %1130 = shalt.err (!%p1127_p1)
}
  0x22   :  { %44 = dma.hbm_to_vmem [thread:$0]  %s1403_s4, 2048, %s39_s16, [#allocation6], %s1160_s11, %s1160_s11, %s1161_s12  }
  0x23   :  { %1153 = dma.done.wait [#allocation3], 512  }
  0x24   :  { %1154 = vsyncadd [#allocation3], 4294966784 }
  0x25   :  { %1155 = dma.done.wait [#allocation6], 2048  }
  0x26   :  { %1156 = vsyncadd [#allocation6], 4294965248  ;;  %v1163_v0 = vmov 0   ;;  %v1245_v1 = vld [vmem:[%s1400_s1] sm:$0xff]  ;;  %v1251_v2 = vld [vmem:[%s1400_s1 + $0x8] sm:$0xff]  ;;  %v1164_v9 = vmov 1  }
  0x27   :  { %1068 = vset.pattern.permute.xlu0 %v1163_v0  ;;  %v492_v3 = vld [vmem:[#allocation2 + $0x10] sm:$0xff]  ;;  %v493_v4 = vld [vmem:[#allocation2 + $0x18] sm:$0xff]  ;;  %v284_v6 = vld [vmem:[#allocation2] sm:$0xff]  ;;  %1069 = vset.pattern.permute.xlu1 %v1164_v9  ;;  %v1165_v33 = vmov 2102212464   ;;  %s1171_s10 = smov [#allocation7]  }
  0x28   :  { %60 = vperm.xlu0 %1068, %v1245_v1   ;;  %v1001_v5 = vpack.c.bf16 %v493_v4, %v492_v3  ;;  %v285_v7 = vld [vmem:[#allocation2 + $0x8] sm:$0xff]  ;;  %779 = vperm.xlu1 %1069, %v1245_v1   ;;  %v893_v10 = vld [vmem:[%s1399_s0] ss:$0 sm:$0xff]  ;;  %v1166_v35 = vmov 920167782   ;;  %s880_s13 = sshll.u32 %s1171_s10, 4  ;;  %s881_s13 = int_to_ptr.vmem [resolvable:$true] %s880_s13 }
  0x29   :  { %v1254_v8 = vpack.c.bf16 %v285_v7, %v284_v6  ;;  %v1167_v39 = vmov 1326507024   ;;  %v1168_v43 = vmov 683565275   ;;  %v1169_v45 = vmov 2475754826   ;;  %p1136_p3 = scmp.lt.s32.totalorder %s881_s13, %s881_s13 }
  0x2a   :  { %1002 = vmatprep.subr.bf16.mxu0 %v1001_v5  ;;  %v1170_v47 = vmov 2131351028   ;;  %s1131_s14 = scalar_lea.vmem %s881_s13, 256 }
  0x2b   :  { %1004 = vmatpush3.bf16.msra.mxu0 %v1001_v5  ;;  %p1132_p2 = scmp.ne.s32.totalorder %s881_s13, %s1131_s14  ;;  %p1137_p4 = scmp.lt.s32.totalorder %s1131_s14, %s1131_s14 }
  0x2c   :  { %65 = vperm.xlu0 %1068, %v1251_v2   ;;  %1006 = vmatprep.subr.bf16.mxu0 %v1254_v8 }
  0x2d   :  { %783 = vperm.xlu1 %1069, %v1251_v2   ;;  %p1138_p5 = por %p1137_p4, %p1136_p3 }
  0x2f   :  { %p1139_p6 = pnand %p1138_p5, %p1132_p2 }
  0x30   :  { %1070 = vset.pattern.permute.xlu0 %v1164_v9 }
  0xa7   :  { %v61_v11 = vpop.permute.xlu0 %60 }
  0xa8   :  { %v1262_v12 = vmul.f32 %v893_v10, %v61_v11 }
  0xaa   :  { %v79_v13 = vand.u32 2139095040, %v1262_v12  ;;  %v76_v20 = vand.u32 2147483647, %v1262_v12 }
  0xab   :  { %v66_v14 = vpop.permute.xlu0 %65 }
  0xac   :  { %v80_v15 = vshrl.u32 %v79_v13, 23  ;;  %v1265_v16 = vmul.f32 %v893_v10, %v66_v14  ;;  %v1274_v25 = vand.u32 8388607, %v76_v20 }
  0xae   :  { %v894_v17 = vadd.s32 4294967169, %v80_v15  ;;  %v180_v18 = vand.u32 2147483647, %v1265_v16  ;;  %v183_v19 = vand.u32 2139095040, %v1265_v16  ;;  %v84_v32 = vor.u32 8388608, %v1274_v25 }
  0xaf   :  { %vm182_vm14 = vcmp.lt.s32.totalorder %v1265_v16, 0 }
  0xb0   :  { %v86_v21 = vadd.s32 1, %v894_v17  ;;  %v184_v22 = vshrl.u32 %v183_v19, 23  ;;  %v187_v23 = vand.u32 8388607, %v180_v18  ;;  %vm1345_vm15 = vcmp.le.f32.partialorder %v180_v18, 0.7853982 }
  0xb2   :  { %vm87_vm0 = vcmp.gt.s32.totalorder %v86_v21, 0  ;;  %v898_v24 = vadd.s32 4294967169, %v184_v22  ;;  %v188_v27 = vor.u32 8388608, %v187_v23 }
  0xb3   :  { %v88_v26 = vsel %vm87_vm0, %v86_v21, 0  ;;  %vm78_vm0 = vcmp.lt.s32.totalorder %v1262_v12, 0 }
  0xb4   :  { %v1276_v28 = vshrl.u32 %v88_v26, 5  ;;  %v90_v29 = vand.u32 31, %v88_v26  ;;  %v190_v30 = vadd.s32 1, %v898_v24  ;;  %v1281_v37 = vshll.u32 %v188_v27, 8 }
  0xb6   :  { %v1278_v31 = vsub.s32 32, %v90_v29  ;;  %v102_v34 = vshll.u32 %v1165_v33, %v90_v29  ;;  %v105_v36 = vshll.u32 %v1166_v35, %v90_v29  ;;  %vm191_vm1 = vcmp.gt.s32.totalorder %v190_v30, 0 }
  0xb7   :  { %vm111_vm2 = vcmp.lt.s32.totalorder %v1276_v28, 4  ;;  %v192_v41 = vsel %vm191_vm1, %v190_v30, 0  ;;  %v93_v44 = vshll.u32 %v1168_v43, %v90_v29  ;;  %v96_v46 = vshll.u32 %v1169_v45, %v90_v29 }
  0xb8   :  { %v103_v38 = vshrl.u32 %v1166_v35, %v1278_v31  ;;  %v106_v40 = vshrl.u32 %v1167_v39, %v1278_v31  ;;  %v194_v42 = vand.u32 31, %v192_v41  ;;  %v99_v48 = vshll.u32 %v1170_v47, %v90_v29 }
  0xb9   :  { %v193_v50 = vshrl.u32 %v192_v41, 5  ;;  %v94_v51 = vshrl.u32 %v1169_v45, %v1278_v31  ;;  %v97_v52 = vshrl.u32 %v1170_v47, %v1278_v31  ;;  %v100_v56 = vshrl.u32 %v1165_v33, %v1278_v31 }
  0xba   :  { %v104_v49 = vor.u32 %v103_v38, %v102_v34  ;;  %v107_v53 = vor.u32 %v106_v40, %v105_v36  ;;  %v195_v54 = vsub.s32 32, %v194_v42  ;;  %v197_v55 = vshll.u32 %v1168_v43, %v194_v42 }
  0xbb   :  { %v200_v58 = vshll.u32 %v1169_v45, %v194_v42  ;;  %v203_v59 = vshll.u32 %v1170_v47, %v194_v42  ;;  %v206_v60 = vshll.u32 %v1165_v33, %v194_v42  ;;  %v209_v0 = vshll.u32 %v1166_v35, %v194_v42 }
  0xbc   :  { %v117_v57 = vsel %vm111_vm2, %v104_v49, 920167782  ;;  %v198_v61 = vshrl.u32 %v1169_v45, %v195_v54  ;;  %v201_v62 = vshrl.u32 %v1170_v47, %v195_v54  ;;  %v204_v63 = vshrl.u32 %v1165_v33, %v195_v54 }
  0xbd   :  { %vm108_vm3 = vcmp.lt.s32.totalorder %v1276_v28, 1  ;;  %v196_v3 = vshrl.u32 %v1168_v43, %v195_v54  ;;  %v207_v4 = vshrl.u32 %v1166_v35, %v195_v54  ;;  %v210_v5 = vshrl.u32 %v1167_v39, %v195_v54 }
  0xbe   :  { %vm212_vm4 = vcmp.lt.s32.totalorder %v193_v50, 1  ;;  %v199_v6 = vor.u32 %v198_v61, %v197_v55  ;;  %v202_v7 = vor.u32 %v201_v62, %v200_v58  ;;  %v205_v9 = vor.u32 %v204_v63, %v203_v59 }
  0xbf   :  { %vm214_vm5 = vcmp.lt.s32.totalorder %v193_v50, 3  ;;  %v208_v10 = vor.u32 %v207_v4, %v206_v60  ;;  %v211_v11 = vor.u32 %v210_v5, %v209_v0  ;;  %vm215_vm6 = vcmp.lt.s32.totalorder %v193_v50, 4 }
  0xc0   :  { %v95_v13 = vor.u32 %v94_v51, %v93_v44  ;;  %v216_v14 = vsel %vm212_vm4, %v196_v3, %v199_v6  ;;  %v217_v15 = vsel %vm215_vm6, %v205_v9, 2102212464  ;;  %v220_v17 = vsel %vm212_vm4, %v199_v6, %v202_v7 }
  0xc1   :  { %v224_v19 = vsel %vm212_vm4, %v202_v7, %v205_v9  ;;  %v218_v21 = vsel %vm214_vm5, %v202_v7, %v217_v15  ;;  %v221_v22 = vsel %vm215_vm6, %v208_v10, 920167782  ;;  %v225_v23 = vsel %vm215_vm6, %v211_v11, 1326507024 }
  0xc2   :  { %v98_v24 = vor.u32 %v97_v52, %v96_v46  ;;  %vm213_vm7 = vcmp.lt.s32.totalorder %v193_v50, 2  ;;  %v222_v26 = vsel %vm214_vm5, %v205_v9, %v221_v22  ;;  %v226_v27 = vsel %vm214_vm5, %v208_v10, %v225_v23 }
  0xc3   :  { %v101_v29 = vor.u32 %v100_v56, %v99_v48  ;;  %v121_v30 = vsel %vm111_vm2, %v107_v53, 1326507024  ;;  %v219_v33 = vsel %vm213_vm7, %v216_v14, %v218_v21  ;;  %v223_v34 = vsel %vm213_vm7, %v220_v17, %v222_v26 }
  0xc4   :  { %v227_v35 = vsel %vm213_vm7, %v224_v19, %v226_v27  ;;  %v1299_v39 = vmul.u32.u64.low %v1281_v37, %v223_v34  ;;  %v1300_v40 = vmul.u32.u64.high %v1281_v37, %v223_v34, %v1299_v39  ;;  %v92_v41 = vshrl.u32 %v1168_v43, %v1278_v31 }
  0xc5   :  { %v1295_v36 = vmul.u32.u64.low %v1281_v37, %v227_v35  ;;  %v1296_v38 = vmul.u32.u64.high %v1281_v37, %v227_v35, %v1295_v36  ;;  %vm110_vm8 = vcmp.lt.s32.totalorder %v1276_v28, 3  ;;  %v113_v42 = vsel %vm111_vm2, %v101_v29, 2102212464 }
  0xc6   :  { %v116_v44 = vsel %vm108_vm3, %v95_v13, %v98_v24  ;;  %vm109_vm9 = vcmp.lt.s32.totalorder %v1276_v28, 2  ;;  %v118_v45 = vsel %vm110_vm8, %v101_v29, %v117_v57  ;;  %v120_v46 = vsel %vm108_vm3, %v98_v24, %v101_v29 }
  0xc7   :  { %v122_v47 = vsel %vm110_vm8, %v104_v49, %v121_v30  ;;  %v235_v31 = vmul.u32 %v1281_v37, %v219_v33  ;;  %v119_v43 = vsel %vm109_vm9, %v116_v44, %v118_v45  ;;  %v124_v50 = vshll.u32 %v84_v32, 8 }
  0xc8   :  { %v123_v48 = vsel %vm109_vm9, %v120_v46, %v122_v47  ;;  %vm237_vm10 = vc.u32 %v1296_v38, %v1299_v39  ;;  %v238_v51 = vadd.s32 1, %v1300_v40  ;;  %v112_v52 = vsel %vm108_vm3, %v92_v41, %v95_v13 }
  0xc9   :  { %v114_v49 = vsel %vm110_vm8, %v98_v24, %v113_v42  ;;  %v1328_v37 = vmul.u32.u64.low %v124_v50, %v123_v48  ;;  %v1329_v53 = vmul.u32.u64.high %v124_v50, %v123_v48, %v1328_v37  ;;  %v236_v17 = vadd.s32 %v1299_v39, %v1296_v38 }
  0xca   :  { %v1331_v54 = vmul.u32.u64.low %v124_v50, %v119_v43  ;;  %v1332_v55 = vmul.u32.u64.high %v124_v50, %v119_v43, %v1331_v54  ;;  %v239_v56 = vsel %vm237_vm10, %v238_v51, %v1300_v40  ;;  %v115_v32 = vsel %vm109_vm9, %v112_v52, %v114_v49 }
  0xcb   :  { %v240_v25 = vadd.s32 %v239_v56, %v235_v31  ;;  %v131_v59 = vmul.u32 %v124_v50, %v115_v32  ;;  %vm77_vm1 = vcmp.le.f32.partialorder %v76_v20, 0.7853982  ;;  %vm494_vm4 = vcmask 130048   ;;  %v692_v50 = vld [vmem:[#allocation5 + $0x60] sm:$0xff] }
  0xcc   :  { %vm133_vm11 = vc.u32 %v1329_v53, %v1331_v54  ;;  %v134_v58 = vadd.s32 1, %v1332_v55  ;;  %v132_v33 = vadd.s32 %v1331_v54, %v1329_v53  ;;  %vm272_vm5 = vweird.f32 %v1265_v16 }
  0xcd   :  { %v241_v57 = vadd.s32 536870912, %v240_v25 }
  0xce   :  { %v135_v61 = vsel %vm133_vm11, %v134_v58, %v1332_v55 }
  0xcf   :  { %v242_v60 = vshrl.u32 %v241_v57, 30  ;;  %v136_v62 = vadd.s32 %v135_v61, %v131_v59 }
  0xd1   :  { %v243_v63 = vshll.u32 %v242_v60, 30  ;;  %v137_v0 = vadd.s32 536870912, %v136_v62  ;;  %v266_v53 = vsub.s32 4, %v242_v60 }
  0xd3   :  { %v244_v3 = vsub.s32 %v240_v25, %v243_v63  ;;  %v138_v4 = vshrl.u32 %v137_v0, 30  ;;  %v267_v56 = vsel %vm182_vm14, %v266_v53, %v242_v60  ;;  %v694_v53 = vld [vmem:[#allocation5 + $0x70] sm:$0xff] }
  0xd4   :  { %v269_v57 = vsel %vm1345_vm15, 0, %v267_v56 }
  0xd5   :  { %v246_v5 = vsub.s32 0, %v244_v3  ;;  %v139_v6 = vshll.u32 %v138_v4, 30  ;;  %v162_v37 = vsub.s32 4, %v138_v4  ;;  %v482_v59 = vand.u32 3, %v269_v57 }
  0xd6   :  { %v273_v0 = vadd.s32 3, %v269_v57 }
  0xd7   :  { %v899_v7 = vmin.u32 %v246_v5, %v244_v3  ;;  %v140_v9 = vsub.s32 %v136_v62, %v139_v6  ;;  %v163_v55 = vsel %vm78_vm0, %v162_v37, %v138_v4  ;;  %vm484_vm2 = vcmp.eq.s32.totalorder %v482_v59, 0 }
  0xd8   :  { %v165_v32 = vsel %vm77_vm1, 0, %v163_v55  ;;  %vm487_vm3 = vcmp.eq.s32.totalorder %v482_v59, 2  ;;  %vm483_vm6 = vcmp.lt.s32.totalorder %v482_v59, 2 }
  0xd9   :  { %v248_v28 = vclz %v899_v7  ;;  %v142_v10 = vsub.s32 0, %v140_v9  ;;  %v169_v58 = vadd.s32 3, %v165_v32  ;;  %v379_v4 = vand.u32 3, %v165_v32 }
  0xdb   :  { %v900_v11 = vadd.s32 4294967294, %v248_v28  ;;  %v895_v13 = vmin.u32 %v142_v10, %v140_v9  ;;  %v274_v28 = vand.u32 3, %v273_v0  ;;  %vm384_vm8 = vcmp.eq.s32.totalorder %v379_v4, 2 }
  0xdc   :  { %vm381_vm10 = vcmp.eq.s32.totalorder %v379_v4, 0 }
  0xdd   :  { %vm901_vm12 = vcmp.lt.s32.totalorder %v900_v11, 0  ;;  %v144_v15 = vclz %v895_v13 }
  0xde   :  { %v251_v14 = vsel %vm901_vm12, 0, %v900_v11  ;;  %vm380_vm12 = vcmp.lt.s32.totalorder %v379_v4, 2 }
  0xdf   :  { %v252_v19 = vsub.s32 32, %v251_v14  ;;  %v256_v21 = vsub.s32 4294967266, %v251_v14  ;;  %v896_v22 = vadd.s32 4294967294, %v144_v15  ;;  %v253_v23 = vshll.u32 %v244_v3, %v251_v14 }
  0xe0   :  { %v170_v3 = vand.u32 3, %v169_v58 }
  0xe1   :  { %v254_v24 = vshrl.u32 %v236_v17, %v252_v19  ;;  %v257_v26 = vadd.s32 127, %v256_v21  ;;  %vm897_vm13 = vcmp.lt.s32.totalorder %v896_v22, 0 }
  0xe2   :  { %v147_v30 = vsel %vm897_vm13, 0, %v896_v22  ;;  %vm175_vm7 = vcmp.eq.s32.totalorder %v170_v3, 2  ;;  %vm172_vm9 = vcmp.eq.s32.totalorder %v170_v3, 0  ;;  %vm171_vm11 = vcmp.lt.s32.totalorder %v170_v3, 2 }
  0xe3   :  { %v255_v27 = vor.u32 %v254_v24, %v253_v23  ;;  %v258_v29 = vshll.u32 %v257_v26, 23  ;;  %v148_v34 = vsub.s32 32, %v147_v30  ;;  %v152_v35 = vsub.s32 4294967266, %v147_v30 }
  0xe4   :  { %v149_v40 = vshll.u32 %v140_v9, %v147_v30  ;;  %vm168_vm13 = vweird.f32 %v1262_v12  ;;  %v680_v30 = vld [vmem:[#allocation5] sm:$0xff] }
  0xe5   :  { %v259_v36 = vor.u32 4788187, %v258_v29  ;;  %v150_v41 = vshrl.u32 %v132_v33, %v148_v34  ;;  %v153_v42 = vadd.s32 127, %v152_v35  ;;  %v262_v38 = vcvt.s32.f32 %v255_v27  ;;  %v681_v33 = vld [vmem:[#allocation5 + $0x8] sm:$0xff]  ;;  %v682_v35 = vld [vmem:[#allocation5 + $0x10] sm:$0xff] }
  0xe6   :  { %v1009_v34 = vpack.c.bf16 %v681_v33, %v680_v30 }
  0xe7   :  { %v260_v44 = vand.u32 2147483647, %v259_v36  ;;  %v151_v39 = vor.u32 %v150_v41, %v149_v40  ;;  %v154_v45 = vshll.u32 %v153_v42, 23  ;;  %v683_v36 = vld [vmem:[#allocation5 + $0x18] sm:$0xff]  ;;  %v685_v41 = vld [vmem:[#allocation5 + $0x28] sm:$0xff] }
  0xe8   :  { %1010 = vmatprep.subr.bf16.mxu1 %v1009_v34  ;;  %v1013_v40 = vpack.c.bf16 %v683_v36, %v682_v35 }
  0xe9   :  { %v263_v46 = vmul.f32 %v262_v38, %v260_v44  ;;  %v155_v47 = vor.u32 4788187, %v154_v45  ;;  %v158_v48 = vcvt.s32.f32 %v151_v39  ;;  %1012 = vmatpush3.bf16.msra.mxu1 %v1009_v34  ;;  %v686_v44 = vld [vmem:[#allocation5 + $0x30] sm:$0xff]  ;;  %v688_v39 = vld [vmem:[#allocation5 + $0x40] sm:$0xff]  ;;  %v689_v45 = vld [vmem:[#allocation5 + $0x48] sm:$0xff] }
  0xea   :  { %1014 = vmatprep.subr.bf16.mxu1 %v1013_v40 }
  0xeb   :  { %v264_v31 = vxor.u32 2147483648, %v263_v46  ;;  %v156_v43 = vand.u32 2147483647, %v155_v47  ;;  %v690_v47 = vld [vmem:[#allocation5 + $0x50] sm:$0xff] }
  0xed   :  { %v265_v51 = vsel %vm182_vm14, %v264_v31, %v263_v46  ;;  %v159_v49 = vmul.f32 %v158_v48, %v156_v43  ;;  %vm276_vm14 = vcmp.eq.s32.totalorder %v274_v28, 0  ;;  %1016 = vmatpush3.bf16.msra.mxu1 %v1013_v40  ;;  %v1025_v46 = vpack.c.bf16 %v689_v45, %v688_v39  ;;  %v691_v31 = vld [vmem:[#allocation5 + $0x58] sm:$0xff]  ;;  %v780_v48 = vpop.permute.xlu1 %779 }
  0xee   :  { %v268_v52 = vsel %vm1345_vm15, %v1265_v16, %v265_v51  ;;  %vm279_vm15 = vcmp.eq.s32.totalorder %v274_v28, 2  ;;  %v687_v16 = vld [vmem:[#allocation5 + $0x38] sm:$0xff]  ;;  %v1029_v43 = vpack.c.bf16 %v691_v31, %v690_v47  ;;  %v693_v51 = vld [vmem:[#allocation5 + $0x68] sm:$0xff] }
  0xef   :  { %1071 = vcosq.f32 %v268_v52  ;;  %v160_v54 = vxor.u32 2147483648, %v159_v49  ;;  %v1021_v38 = vpack.c.bf16 %v687_v16, %v686_v44  ;;  %v1033_v37 = vpack.c.bf16 %v693_v51, %v692_v50 }
  0xf0   :  { %1073 = vsinq.f32 %v268_v52  ;;  %v788_v52 = vld [vmem:[%s1405_s6] sm:$0xff] }
  0xf1   :  { %v161_v18 = vsel %vm78_vm0, %v160_v54, %v159_v49  ;;  %vm275_vm0 = vcmp.lt.s32.totalorder %v274_v28, 2  ;;  %v786_v49 = vmul.f32 %v780_v48, %v1245_v1  ;;  %v695_v54 = vld [vmem:[#allocation5 + $0x78] sm:$0xff]  ;;  %v784_v55 = vpop.permute.xlu1 %783  ;;  %v915_v28 = vld [vmem:[%s1404_s5] ss:$0 sm:$0xff] }
  0xf2   :  { %v164_v25 = vsel %vm77_vm1, %v1262_v12, %v161_v18  ;;  %vm789_vm1 = vcmask 64512   ;;  %v1037_v18 = vpack.c.bf16 %v695_v54, %v694_v53  ;;  %v787_v56 = vmul.f32 %v784_v55, %v1251_v2 }
  0xf3   :  { %1075 = vcosq.f32 %v164_v25 }
  0xf4   :  { %1077 = vsinq.f32 %v164_v25  ;;  %v914_v25 = vld [vmem:[%s1402_s3] ss:$0 sm:$0xff] }
  0xf9   :  { %v1072_v61 = vpop.eup %1071 }
  0xfa   :  { %v1074_v62 = vpop.eup %1073  ;;  %v280_v63 = vxor.u32 2147483648, %v1072_v61 }
  0xfb   :  { %v277_v20 = vxor.u32 2147483648, %v1074_v62 }
  0xfc   :  { %v489_v5 = vsel %vm487_vm3, %v280_v63, %v1074_v62  ;;  %v281_v27 = vsel %vm279_vm15, %v280_v63, %v1074_v62 }
  0xfd   :  { %v486_v60 = vsel %vm484_vm2, %v1072_v61, %v277_v20  ;;  %v1076_v6 = vpop.eup %1075  ;;  %v278_v26 = vsel %vm276_vm14, %v1072_v61, %v277_v20 }
  0xfe   :  { %v1078_v7 = vpop.eup %1077  ;;  %v176_v9 = vxor.u32 2147483648, %v1076_v6  ;;  %v490_v11 = vsel %vm483_vm6, %v486_v60, %v489_v5  ;;  %v282_v12 = vsel %vm275_vm0, %v278_v26, %v281_v27 }
  0xff   :  { %v173_v10 = vxor.u32 2147483648, %v1078_v7  ;;  %v491_v22 = vsel %vm272_vm5, nan, %v490_v11  ;;  %v283_v29 = vsel %vm272_vm5, nan, %v282_v12 }
 0x100   :  { %v177_v13 = vsel %vm175_vm7, %v176_v9, %v1078_v7  ;;  %v386_v14 = vsel %vm384_vm8, %v176_v9, %v1078_v7 }
 0x101   :  { %v174_v15 = vsel %vm172_vm9, %v1076_v6, %v173_v10  ;;  %v383_v17 = vsel %vm381_vm10, %v1076_v6, %v173_v10 }
 0x102   :  { %v178_v19 = vsel %vm171_vm11, %v174_v15, %v177_v13  ;;  %v387_v21 = vsel %vm380_vm12, %v383_v17, %v386_v14 }
 0x103   :  { %v388_v23 = vsel %vm168_vm13, nan, %v387_v21  ;;  %v179_v24 = vsel %vm168_vm13, nan, %v178_v19 }
 0x104   :  { %951 = vmatprep.mubr.msk.f32.mxu0 %vm494_vm4, %v388_v23 }
 0x105   :  { %952 = vmatmul.mubr.msk.f32.vlgmr.msra.gmra.mrb[0].mxu0 %vm494_vm4, %v491_v22 }
 0x106   :  { %1008 = vmatpush3.bf16.msra.mxu0 %v1254_v8  ;;  %958 = vmatprep.mubr.msk.f32.mxu0 %vm494_vm4, %v179_v24  ;;  %v684_v8 = vld [vmem:[#allocation5 + $0x20] sm:$0xff] }
 0x107   :  { %v1017_v42 = vpack.c.bf16 %v685_v41, %v684_v8  ;;  %996 = vmatprep.subr.mxu0 %v788_v52 }
 0x109   :  { %1018 = vmatprep.subr.bf16.mxu1 %v1017_v42 }
 0x10a   :  { %1020 = vmatpush3.bf16.msra.mxu1 %v1017_v42 }
 0x10b   :  { %1022 = vmatprep.subr.bf16.mxu1 %v1021_v38 }
 0x10d   :  { %959 = vmatmul.mubr.msk.f32.vlgmr.msra.gmra.mrb[0].mxu0 %vm494_vm4, %v283_v29 }
 0x10e   :  { %1024 = vmatpush3.bf16.msra.mxu1 %v1021_v38  ;;  %997 = vmatpush3.msra.mxu0 %v788_v52 }
 0x10f   :  { %1026 = vmatprep.subr.bf16.mxu1 %v1025_v46  ;;  %998 = vmatprep.mubr.msk.f32.mxu0 %vm789_vm1, %v786_v49 }
 0x111   :  { %999 = vmatmul.mubr.msk.f32.vlgmr.msra.gmra.mrb[2].mxu0 %vm789_vm1, %v787_v56 }
 0x112   :  { %1028 = vmatpush3.bf16.msra.mxu1 %v1025_v46 }
 0x113   :  { %1030 = vmatprep.subr.bf16.mxu1 %v1029_v43 }
 0x116   :  { %1032 = vmatpush3.bf16.msra.mxu1 %v1029_v43 }
 0x117   :  { %1034 = vmatprep.subr.bf16.mxu1 %v1033_v37 }
 0x11a   :  { %1036 = vmatpush3.bf16.msra.mxu1 %v1033_v37 }
 0x11b   :  { %1038 = vmatprep.subr.bf16.mxu1 %v1037_v18 }
 0x11e   :  { %1040 = vmatpush3.bf16.msra.mxu1 %v1037_v18 }
 0x1e0   :  { %v960_v1 = vpop.f32.mrb[0].mxu0 }
 0x1e1   :  { %v665_v32 = vadd.f32 %v960_v1, %v914_v25  ;;  %v648_v57 = vpop.f32.mrb[1].mxu0 }
 0x1e2   :  { %v664_v58 = vadd.f32 %v914_v25, %v648_v57 }
 0x1e3   :  { %v667_v59 = vsub.f32 0.0, %v665_v32 }
 0x1e4   :  { %v666_v61 = vsub.f32 0.0, %v664_v58  ;;  %v1000_v7 = vpop.f32.mrb[2].mxu0 }
 0x1e5   :  { %v670_v62 = vmul.f32 1.442695, %v667_v59  ;;  %v862_v9 = vpop.f32.mrb[3].mxu0 }
 0x1e6   :  { %v668_v63 = vmul.f32 1.442695, %v666_v61 }
 0x1e7   :  { %1079 = vpow2.f32 %v670_v62 }
 0x1e8   :  { %1081 = vpow2.f32 %v668_v63 }
 0x1f1   :  { %v1080_v0 = vpop.eup %1079 }
 0x1f2   :  { %v1082_v20 = vpop.eup %1081  ;;  %v673_v2 = vadd.f32 1.0, %v1080_v0 }
 0x1f3   :  { %v672_v3 = vadd.f32 1.0, %v1082_v20 }
 0x1f4   :  { %1083 = vrcp.f32 %v673_v2 }
 0x1f5   :  { %1085 = vrcp.f32 %v672_v3 }
 0x1fe   :  { %v1084_v4 = vpop.eup %1083 }
 0x1ff   :  { %v1086_v60 = vpop.eup %1085  ;;  %v679_v6 = vmul.f32 %v1084_v4, %v665_v32 }
 0x200   :  { %v678_v5 = vmul.f32 %v1086_v60, %v664_v58 }
 0x202   :  { %993 = vmatprep.mubr.f32.mxu1 %v678_v5 }
 0x203   :  { %994 = vmatmul.mubr.f32.vlgmr.msra.gmra.mrb[0].mxu1 %v679_v6 }
 0x2d6   :  { %v995_v10 = vpop.f32.mrb[0].mxu1 }
 0x2d7   :  { %v775_v11 = vadd.f32 %v995_v10, %v915_v28  ;;  %v769_v13 = vpop.f32.mrb[1].mxu1 }
 0x2d8   :  { %v770_v14 = vadd.f32 %v915_v28, %v769_v13 }
 0x2d9   :  { %v872_v15 = vadd.f32 %v1000_v7, %v775_v11 }
 0x2da   :  { %v871_v17 = vadd.f32 %v862_v9, %v770_v14 }
 0x2db   :  { %874 = vst [vmem:[#allocation7 + $0x8] sm:$0xff] %v872_v15 }
 0x2dc   :  { %873 = vst [vmem:[#allocation7] sm:$0xff] %v871_v17 }
 0x2dd   :  { %1142 = shalt.err (!%p1139_p6)
}
 0x2de   :  { %s1143_s16 = scalar_lea.hbm %s1406_s7, 256 }
 0x2df   :  { %p1144_p7 = scmp.ne.s32.totalorder %s1406_s7, %s1143_s16  ;;  %p1147_p8 = scmp.lt.u32.totalorder %s1143_s16, %s1406_s7 }
 0x2e1   :  { %p1149_p9 = pnand %p1147_p8, %p1144_p7 }
 0x2e3   :  { %1152 = shalt.err (!%p1149_p9)
}
 0x2e4   :  { %886 = dma.vmem_to_hbm [thread:$0]  %s881_s13, 256, %s1406_s7, [#allocation4], %s1160_s11, %s1160_s11, %s1161_s12  }
 0x2e5   :  { %1157 = dma.done.wait [#allocation4], 256  }
 0x2e6   :  { %1158 = vsyncadd [#allocation4], 4294967040 }
 0x2e7   :  { %890 = vsyncpa [#allocation3], 1 }
 0x2e8   :  { %891 = vsyncpa [#allocation6], 1 }
 0x2e9   :  { %892 = vsyncpa [#allocation4], 1 }

</bundles_post_ra>
